<compile_context>
chip_gen: v7x
topology: tpu7x:2x2x1
jax: 0.10.0
libtpu: 0.0.40
codegen_flags: <defaults>
</compile_context>

<pallas_src>
import jax
import jax.numpy as jnp
from jax.experimental import pallas as pl
from jax.experimental.pallas import tpu as pltpu

B = 2
C_IN, HS, WS = 4, 3, 3
NPIX = HS * WS                 # 9
C_MID = 20
FLAT = C_MID * NPIX            # 180, matches nn.Linear(3*3*20, 1000)
HID = 1000
N_MOVES = 8
HEAD_W = 16                    # packed head: [8 move logits | 1 value logit | 7 pad]


# ---------------------------------------------------------------------------
# Single fused kernel: conv1 -> relu -> conv2 -> relu -> lin1 -> packed heads
#   x_ref : (B, 36)       NCHW-flattened board (channel-major c*9+p)
#   w1bd  : (36, 180)     conv1 as block-diagonal matmul (pixel-major output)
#   w2bd  : (180, 180)    conv2 as block-diagonal matmul
#   wl    : (180, 1000)   lin1, rows pre-permuted to pixel-major, bf16
#   wh    : (1000, 16)    [pLin | vLin | zero-pad] packed head weight
#   out   : (B, 16)       [softmax(p) (8) | sigmoid(v) (1) | zeros (7)]
# ---------------------------------------------------------------------------
def _fused_forward_kernel(x_ref, w1_ref, b1_ref, w2_ref, b2_ref,
                          wl_ref, bl_ref, wh_ref, bh_ref, out_ref):
    # conv1 (1x1) + ReLU : (B,36) @ (36,180)
    h1 = jnp.dot(x_ref[...], w1_ref[...], preferred_element_type=jnp.float32)
    h1 = jnp.maximum(h1 + b1_ref[...], 0.0)
    # conv2 (1x1) + ReLU : (B,180) @ (180,180)
    h2 = jnp.dot(h1, w2_ref[...], preferred_element_type=jnp.float32)
    h2 = jnp.maximum(h2 + b2_ref[...], 0.0)
    # TODO(synk): nn.Dropout(p=0.3) — inference behaviour (identity); no train-mode mask.
    # lin1 (pre-permuted bf16 weights, f32 accumulation) : (B,180) @ (180,1000)
    lin = jnp.dot(h2.astype(jnp.bfloat16), wl_ref[...],
                  preferred_element_type=jnp.float32) + bl_ref[...]
    # packed heads [pLin | vLin | pad] : (B,1000) @ (1000,16)
    heads = jnp.dot(lin, wh_ref[...], preferred_element_type=jnp.float32) + bh_ref[...]

    col = jax.lax.broadcasted_iota(jnp.int32, heads.shape, 1)
    is_p = col < N_MOVES
    # masked softmax over the 8 move lanes
    plogits = jnp.where(is_p, heads, jnp.float32(-1e30))
    m = jnp.max(plogits, axis=1, keepdims=True)
    e = jnp.where(is_p, jnp.exp(plogits - m), 0.0)
    p_full = e * pl.reciprocal(jnp.sum(e, axis=1, keepdims=True), approx=True)
    # sigmoid on every lane; only lane 8 (value head) is kept
    v_full = pl.reciprocal(1.0 + jnp.exp(-heads), approx=True)
    out_ref[...] = jnp.where(is_p, p_full,
                             jnp.where(col == N_MOVES, v_full, 0.0))


# ---------------------------------------------------------------------------
# Parameters (torch layouts) + one-time conversion to fused-kernel layouts.
# ---------------------------------------------------------------------------
def init_params(key):
    """PyTorch-default-style uniform(-1/sqrt(fan_in)) init, torch layouts."""
    ks = jax.random.split(key, 10)

    def u(k, shape, fan_in):
        bound = 1.0 / jnp.sqrt(jnp.float32(fan_in))
        return jax.random.uniform(k, shape, jnp.float32, -bound, bound)

    return dict(
        conv1_w=u(ks[0], (C_MID, C_IN, 1, 1), C_IN),
        conv1_b=u(ks[1], (C_MID,), C_IN),
        conv2_w=u(ks[2], (C_MID, C_MID, 1, 1), C_MID),
        conv2_b=u(ks[3], (C_MID,), C_MID),
        lin1_w=u(ks[4], (HID, FLAT), FLAT),
        lin1_b=u(ks[5], (HID,), FLAT),
        pLin_w=u(ks[6], (N_MOVES, HID), HID),
        pLin_b=u(ks[7], (N_MOVES,), HID),
        vLin_w=u(ks[8], (1, HID), HID),
        vLin_b=u(ks[9], (1,), HID),
    )


def prepare_params(params):
    """One-time conversion from torch-layout params to fused-kernel layouts."""
    eye = jnp.eye(NPIX, dtype=jnp.float32)
    w1_io = params["conv1_w"].reshape(C_MID, C_IN).T       # (4, 20)   [in, out]
    w2_io = params["conv2_w"].reshape(C_MID, C_MID).T      # (20, 20)  [in, out]
    # 1x1 conv == per-pixel channel matmul == block-diagonal matmul.
    # w1bd rows are channel-major (c*9+p)  -> matches x.reshape(B, 36) (NCHW).
    # w1bd cols / w2bd rows+cols are pixel-major (p*20+c).
    w1bd = jnp.einsum("ck,pq->cpqk", w1_io, eye).reshape(C_IN * NPIX, FLAT)
    w2bd = jnp.einsum("jk,pq->pjqk", w2_io, eye).reshape(FLAT, FLAT)
    b1t = jnp.tile(params["conv1_b"], NPIX).reshape(1, FLAT)
    b2t = jnp.tile(params["conv2_b"], NPIX).reshape(1, FLAT)
    # lin1 rows permuted from torch's (C,H,W) flatten order to the kernel's
    # pixel-major (H,W,C) order; stored bf16 for the MXU fast path.
    wl = params["lin1_w"].T                                 # (180, 1000), rows c*9+p
    wl = wl.reshape(C_MID, NPIX, HID).transpose(1, 0, 2).reshape(FLAT, HID)
    # pack pLin (1000,8) and vLin (1000,1) into one (1000,16) head weight.
    wh = jnp.zeros((HID, HEAD_W), jnp.float32)
    wh = wh.at[:, :N_MOVES].set(params["pLin_w"].T)
    wh = wh.at[:, N_MOVES].set(params["vLin_w"][0])
    bh = jnp.zeros((1, HEAD_W), jnp.float32)
    bh = bh.at[0, :N_MOVES].set(params["pLin_b"])
    bh = bh.at[0, N_MOVES].set(params["vLin_b"][0])
    return dict(
        w1bd=w1bd, b1t=b1t, w2bd=w2bd, b2t=b2t,
        wl=wl.astype(jnp.bfloat16), bl=params["lin1_b"].reshape(1, HID),
        wh=wh, bh=bh,
    )


# ---------------------------------------------------------------------------
# Forward pass (single pallas_call) + plain-JAX reference for validation.
# ---------------------------------------------------------------------------
@jax.jit
def conv_model_forward(x_nchw, kp):
    """Matches PyTorch Conv.forward: returns (p of shape (B, 8), v of shape (1,))."""
    b = x_nchw.shape[0]
    x_flat = x_nchw.reshape(b, C_IN * NPIX)      # NCHW flatten — no transpose needed
    vmem = pl.BlockSpec(memory_space=pltpu.MemorySpace.VMEM)
    packed = pl.pallas_call(
        _fused_forward_kernel,
        out_shape=jax.ShapeDtypeStruct((b, HEAD_W), jnp.float32),
        in_specs=[vmem] * 9,
        out_specs=vmem,
    )(x_flat, kp["w1bd"], kp["b1t"], kp["w2bd"], kp["b2t"],
      kp["wl"], kp["bl"], kp["wh"], kp["bh"])
    p = packed[:, :N_MOVES]
    v = packed[0, N_MOVES:N_MOVES + 1]           # matches `self.sig(self.vLin(...))[0]` -> (1,)
    return p, v


def reference_forward(x_nchw, params):
    """Pure-JAX re-statement of the PyTorch forward (f32 throughout)."""
    w1 = params["conv1_w"].reshape(C_MID, C_IN)
    h1 = jnp.einsum("bchw,kc->bkhw", x_nchw, w1) + params["conv1_b"][None, :, None, None]
    h1 = jnp.maximum(h1, 0.0)
    w2 = params["conv2_w"].reshape(C_MID, C_MID)
    h2 = jnp.einsum("bchw,kc->bkhw", h1, w2) + params["conv2_b"][None, :, None, None]
    h2 = jnp.maximum(h2, 0.0)
    flat = h2.reshape(h2.shape[0], -1)
    lin = flat @ params["lin1_w"].T + params["lin1_b"]
    p = jax.nn.softmax(lin @ params["pLin_w"].T + params["pLin_b"], axis=1)
    v = jax.nn.sigmoid(lin @ params["vLin_w"].T + params["vLin_b"])[0]
    return p, v


if __name__ == "__main__":
    key = jax.random.PRNGKey(0)
    k_x, k_p = jax.random.split(key)

    # Board tensor: (batch=2, channels=4 [shots, walls, enemies, player], 3, 3)
    x = jax.random.uniform(k_x, (B, C_IN, HS, WS), jnp.float32)
    params = init_params(k_p)
    kparams = prepare_params(params)

    p, v = conv_model_forward(x, kparams)
    jax.block_until_ready((p, v))

    assert p.shape == (B, N_MOVES) and v.shape == (1,)
    assert bool(jnp.all(jnp.isfinite(p))) and bool(jnp.isfinite(v[0]))
    # softmax rows sum to ~1 (EUP approx reciprocal), sigmoid output in (0, 1)
    assert bool(jnp.allclose(jnp.sum(p, axis=1), 1.0, atol=1e-2))
    assert 0.0 < float(v[0]) < 1.0

    # validate against the f32 plain-JAX reference (bf16 lin1 + approx reciprocal)
    p_ref, v_ref = reference_forward(x, params)
    assert bool(jnp.allclose(p, p_ref, atol=3e-2))
    assert bool(jnp.allclose(v, v_ref, atol=3e-2))

    print("KERNEL_OK")
</pallas_src>

<mosaic_0001>
module attributes {stable_mosaic.version = 11 : i64} {
  func.func @_fused_forward_kernel(%arg0: memref<2x36xf32, #tpu.memory_space<vmem>>, %arg1: memref<36x180xf32, #tpu.memory_space<vmem>>, %arg2: memref<1x180xf32, #tpu.memory_space<vmem>>, %arg3: memref<180x180xf32, #tpu.memory_space<vmem>>, %arg4: memref<1x180xf32, #tpu.memory_space<vmem>>, %arg5: memref<180x1000xbf16, #tpu.memory_space<vmem>>, %arg6: memref<1x1000xf32, #tpu.memory_space<vmem>>, %arg7: memref<1000x16xf32, #tpu.memory_space<vmem>>, %arg8: memref<1x16xf32, #tpu.memory_space<vmem>>, %arg9: memref<2x16xf32, #tpu.memory_space<vmem>>) attributes {dimension_semantics = [], scalar_prefetch = 0 : i64, scratch_operands = 0 : i64, tpu.core_type = #tpu.core_type<tc>} {
    %c0 = arith.constant 0 : index
    %c0_0 = arith.constant 0 : index
    %0 = vector.load %arg0[%c0, %c0_0] : memref<2x36xf32, #tpu.memory_space<vmem>>, vector<2x36xf32>
    %c0_1 = arith.constant 0 : index
    %c0_2 = arith.constant 0 : index
    %1 = vector.load %arg1[%c0_1, %c0_2] : memref<36x180xf32, #tpu.memory_space<vmem>>, vector<36x180xf32>
    %cst = arith.constant dense<0.000000e+00> : vector<2x180xf32>
    %2 = tpu.matmul %0, %1, %cst {dimension_numbers = #tpu.dot_dimension_numbers<[1], [0], [0], [1], [0, 0, 1, 1], [], []>} : vector<2x36xf32>, vector<36x180xf32>, vector<2x180xf32> -> vector<2x180xf32>
    %c0_3 = arith.constant 0 : index
    %c0_4 = arith.constant 0 : index
    %3 = vector.load %arg2[%c0_3, %c0_4] : memref<1x180xf32, #tpu.memory_space<vmem>>, vector<1x180xf32>
    %4 = vector.broadcast %3 : vector<1x180xf32> to vector<2x180xf32>
    %5 = arith.addf %2, %4 : vector<2x180xf32>
    %cst_5 = arith.constant 0.000000e+00 : f32
    %6 = vector.broadcast %cst_5 : f32 to vector<2x180xf32>
    %7 = arith.maximumf %5, %6 : vector<2x180xf32>
    %c0_6 = arith.constant 0 : index
    %c0_7 = arith.constant 0 : index
    %8 = vector.load %arg3[%c0_6, %c0_7] : memref<180x180xf32, #tpu.memory_space<vmem>>, vector<180x180xf32>
    %cst_8 = arith.constant dense<0.000000e+00> : vector<2x180xf32>
    %9 = tpu.matmul %7, %8, %cst_8 {dimension_numbers = #tpu.dot_dimension_numbers<[1], [0], [0], [1], [0, 0, 1, 1], [], []>} : vector<2x180xf32>, vector<180x180xf32>, vector<2x180xf32> -> vector<2x180xf32>
    %c0_9 = arith.constant 0 : index
    %c0_10 = arith.constant 0 : index
    %10 = vector.load %arg4[%c0_9, %c0_10] : memref<1x180xf32, #tpu.memory_space<vmem>>, vector<1x180xf32>
    %11 = vector.broadcast %10 : vector<1x180xf32> to vector<2x180xf32>
    %12 = arith.addf %9, %11 : vector<2x180xf32>
    %cst_11 = arith.constant 0.000000e+00 : f32
    %13 = vector.broadcast %cst_11 : f32 to vector<2x180xf32>
    %14 = arith.maximumf %12, %13 : vector<2x180xf32>
    %15 = arith.truncf %14 : vector<2x180xf32> to vector<2x180xbf16>
    %c0_12 = arith.constant 0 : index
    %c0_13 = arith.constant 0 : index
    %16 = vector.load %arg5[%c0_12, %c0_13] : memref<180x1000xbf16, #tpu.memory_space<vmem>>, vector<180x1000xbf16>
    %cst_14 = arith.constant dense<0.000000e+00> : vector<2x1000xf32>
    %17 = tpu.matmul %15, %16, %cst_14 {dimension_numbers = #tpu.dot_dimension_numbers<[1], [0], [0], [1], [0, 0, 1, 1], [], []>} : vector<2x180xbf16>, vector<180x1000xbf16>, vector<2x1000xf32> -> vector<2x1000xf32>
    %c0_15 = arith.constant 0 : index
    %c0_16 = arith.constant 0 : index
    %18 = vector.load %arg6[%c0_15, %c0_16] : memref<1x1000xf32, #tpu.memory_space<vmem>>, vector<1x1000xf32>
    %19 = vector.broadcast %18 : vector<1x1000xf32> to vector<2x1000xf32>
    %20 = arith.addf %17, %19 : vector<2x1000xf32>
    %c0_17 = arith.constant 0 : index
    %c0_18 = arith.constant 0 : index
    %21 = vector.load %arg7[%c0_17, %c0_18] : memref<1000x16xf32, #tpu.memory_space<vmem>>, vector<1000x16xf32>
    %cst_19 = arith.constant dense<0.000000e+00> : vector<2x16xf32>
    %22 = tpu.matmul %20, %21, %cst_19 {dimension_numbers = #tpu.dot_dimension_numbers<[1], [0], [0], [1], [0, 0, 1, 1], [], []>} : vector<2x1000xf32>, vector<1000x16xf32>, vector<2x16xf32> -> vector<2x16xf32>
    %c0_20 = arith.constant 0 : index
    %c0_21 = arith.constant 0 : index
    %23 = vector.load %arg8[%c0_20, %c0_21] : memref<1x16xf32, #tpu.memory_space<vmem>>, vector<1x16xf32>
    %24 = vector.broadcast %23 : vector<1x16xf32> to vector<2x16xf32>
    %25 = arith.addf %22, %24 : vector<2x16xf32>
    %26 = tpu.iota {dimensions = array<i32: 1>} : vector<2x16xi32>
    %c8_i32 = arith.constant 8 : i32
    %27 = vector.broadcast %c8_i32 : i32 to vector<2x16xi32>
    %28 = arith.cmpi slt, %26, %27 : vector<2x16xi32>
    %cst_22 = arith.constant -1.000000e+30 : f32
    %29 = vector.broadcast %cst_22 : f32 to vector<2x16xf32>
    %30 = arith.select %28, %25, %29 : vector<2x16xi1>, vector<2x16xf32>
    %cst_23 = arith.constant dense<0xFF800000> : vector<2xf32>
    %31 = vector.multi_reduction <maximumf>, %30, %cst_23 [1] : vector<2x16xf32> to vector<2xf32>
    %32 = vector.shape_cast %31 : vector<2xf32> to vector<2x1xf32>
    %33 = vector.broadcast %32 : vector<2x1xf32> to vector<2x16xf32>
    %34 = arith.subf %30, %33 : vector<2x16xf32>
    %35 = math.exp %34 : vector<2x16xf32>
    %cst_24 = arith.constant 0.000000e+00 : f32
    %36 = vector.broadcast %cst_24 : f32 to vector<2x16xf32>
    %37 = arith.select %28, %35, %36 : vector<2x16xi1>, vector<2x16xf32>
    %cst_25 = arith.constant dense<0.000000e+00> : vector<2xf32>
    %38 = vector.multi_reduction <add>, %37, %cst_25 [1] : vector<2x16xf32> to vector<2xf32>
    %39 = vector.shape_cast %38 : vector<2xf32> to vector<2x1xf32>
    %40 = tpu.reciprocal %39 {approx = true} : vector<2x1xf32> -> vector<2x1xf32>
    %41 = vector.broadcast %40 : vector<2x1xf32> to vector<2x16xf32>
    %42 = arith.mulf %37, %41 : vector<2x16xf32>
    %cst_26 = arith.constant 0.000000e+00 : f32
    %43 = vector.broadcast %cst_26 : f32 to vector<2x16xf32>
    %44 = arith.subf %43, %25 : vector<2x16xf32>
    %45 = math.exp %44 : vector<2x16xf32>
    %cst_27 = arith.constant 1.000000e+00 : f32
    %46 = vector.broadcast %cst_27 : f32 to vector<2x16xf32>
    %47 = arith.addf %46, %45 : vector<2x16xf32>
    %48 = tpu.reciprocal %47 {approx = true} : vector<2x16xf32> -> vector<2x16xf32>
    %c8_i32_28 = arith.constant 8 : i32
    %49 = vector.broadcast %c8_i32_28 : i32 to vector<2x16xi32>
    %50 = arith.cmpi eq, %26, %49 : vector<2x16xi32>
    %cst_29 = arith.constant 0.000000e+00 : f32
    %51 = vector.broadcast %cst_29 : f32 to vector<2x16xf32>
    %52 = arith.select %50, %48, %51 : vector<2x16xi1>, vector<2x16xf32>
    %53 = arith.select %28, %42, %52 : vector<2x16xi1>, vector<2x16xf32>
    %c0_30 = arith.constant 0 : index
    %c0_31 = arith.constant 0 : index
    %54 = vector.load %arg9[%c0_30, %c0_31] : memref<2x16xf32, #tpu.memory_space<vmem>>, vector<2x16xf32>
    tpu.vector_store %arg9[%c0_30, %c0_31], %53 {strides = array<i32>} : memref<2x16xf32, #tpu.memory_space<vmem>>, vector<2x16xf32>,
    return
  }
}

</mosaic_0001>

<bundles_post_ra>
// kernel: conv_model_forward.1
= control target key start
LH: loop header
LB: loop body
LE: loop exit
PB: predicated region body
PF: predicated region fallthrough
CT: control target
= control target key end

     0   :  { %v1940_v3 = vmov 0.0   ;;  %vm60_vm0 = vcmask 1043456   ;;  %vm56_vm1 = vcmask 293888   ;;  %vm198_vm2 = vcmask 424960   ;;  %s2917_s1 = inlined_call_operand.vmem [shape: f32[36,180], index: 1, kind: input, shape index: {}]   ;;  %s2918_s3 = inlined_call_operand.vmem [shape: f32[180,180], index: 3, kind: input, shape index: {}]   ;;  %s2919_s0 = inlined_call_operand.vmem [shape: f32[2,36], index: 0, kind: input, shape index: {}]   ;;  %s2920_s5 = inlined_call_operand.vmem [shape: bf16[180,1000], index: 5, kind: input, shape index: {}]   ;;  %s2921_s2 = inlined_call_operand.vmem [shape: f32[1,180], index: 2, kind: input, shape index: {}]   ;;  %s2922_s4 = inlined_call_operand.vmem [shape: f32[1,180], index: 4, kind: input, shape index: {}]   ;;  %s2923_s7 = inlined_call_operand.vmem [shape: f32[1000,16], index: 7, kind: input, shape index: {}]   ;;  %s2924_s6 = inlined_call_operand.vmem [shape: f32[1,1000], index: 6, kind: input, shape index: {}]   ;;  %s2925_s8 = inlined_call_operand.vmem [shape: f32[1,16], index: 8, kind: input, shape index: {}]   ;;  %s2926_s9 = inlined_call_operand.vmem [shape: f32[2,16], index: 9, kind: output, shape index: {}]  }
   0x1   :  { %v35_v0 = vld [vmem:[%s2917_s1 + $0x8] sm:$0xff]  ;;  %v37_v1 = vld [vmem:[%s2917_s1 + $0x18] sm:$0xff]  ;;  %v34_v2 = vld [vmem:[%s2917_s1] sm:$0xff]  ;;  %131 = vmatprep.mubr.f32.mxu0 %v1940_v3  ;;  %vm880_vm3 = vcmask 1041408   ;;  %vm1201_vm4 = vcmask 850944   ;;  %vm1489_vm6 = vcmask 123904  }
   0x2   :  { %v1732_v4 = vpack.c.bf16 %v37_v1, %v35_v0  ;;  %v36_v5 = vld [vmem:[%s2917_s1 + $0x10] sm:$0xff]  ;;  %v39_v6 = vld [vmem:[%s2917_s1 + $0x28] sm:$0xff]  ;;  %v41_v7 = vld [vmem:[%s2917_s1 + $0x38] sm:$0xff] }
   0x3   :  { %v1734_v8 = vpack.c.bf16 %v36_v5, %v34_v2  ;;  %v1736_v9 = vpack.c.bf16 %v41_v7, %v39_v6  ;;  %v38_v10 = vld [vmem:[%s2917_s1 + $0x20] sm:$0xff]  ;;  %v40_v11 = vld [vmem:[%s2917_s1 + $0x30] sm:$0xff]  ;;  %v141_v12 = vld [vmem:[%s2918_s3 + $0x8] sm:$0xff] }
   0x4   :  { %1733 = vmatprep.subr.bf16.mxu0 %v1732_v4  ;;  %v1738_v13 = vpack.c.bf16 %v40_v11, %v38_v10  ;;  %v43_v14 = vld [vmem:[%s2917_s1 + $0x48] sm:$0xf]  ;;  %v143_v15 = vld [vmem:[%s2918_s3 + $0x18] sm:$0xff]  ;;  %v140_v16 = vld [vmem:[%s2918_s3] sm:$0xff] }
   0x5   :  { %1735 = vmatpush1.bf16.msra.mxu0 %v1734_v8  ;;  %v142_v17 = vld [vmem:[%s2918_s3 + $0x10] sm:$0xff]  ;;  %v1740_v18 = vpack.c.bf16 %v143_v15, %v141_v12  ;;  %v145_v20 = vld [vmem:[%s2918_s3 + $0x28] sm:$0xff]  ;;  %v147_v21 = vld [vmem:[%s2918_s3 + $0x38] sm:$0xff] }
   0x6   :  { %1737 = vmatprep.subr.bf16.mxu0 %v1736_v9  ;;  %v1742_v19 = vpack.c.bf16 %v142_v17, %v140_v16  ;;  %v144_v22 = vld [vmem:[%s2918_s3 + $0x20] sm:$0xff]  ;;  %v1744_v23 = vpack.c.bf16 %v147_v21, %v145_v20  ;;  %v146_v24 = vld [vmem:[%s2918_s3 + $0x30] sm:$0xff]  ;;  %v149_v25 = vld [vmem:[%s2918_s3 + $0x48] sm:$0xff] }
   0x7   :  { %v151_v26 = vld [vmem:[%s2918_s3 + $0x58] sm:$0xff]  ;;  %1741 = vmatprep.subr.bf16.mxu1 %v1740_v18  ;;  %v1746_v27 = vpack.c.bf16 %v146_v24, %v144_v22  ;;  %v42_v28 = vld [vmem:[%s2917_s1 + $0x40] sm:$0xf]  ;;  %v150_v31 = vld [vmem:[%s2918_s3 + $0x50] sm:$0xff] }
   0x8   :  { %1743 = vmatpush1.bf16.msra.mxu1 %v1742_v19  ;;  %v1748_v29 = vpack.c.bf16 %v151_v26, %v149_v25  ;;  %v148_v30 = vld [vmem:[%s2918_s3 + $0x40] sm:$0xff]  ;;  %v153_v33 = vld [vmem:[%s2918_s3 + $0x68] sm:$0xff]  ;;  %v155_v34 = vld [vmem:[%s2918_s3 + $0x78] sm:$0xff] }
   0x9   :  { %1739 = vmatpush1.bf16.msra.mxu0 %v1738_v13  ;;  %1745 = vmatprep.subr.bf16.mxu1 %v1744_v23  ;;  %v33_v32 = vld [vmem:[%s2919_s0] sm:$0x3]  ;;  %v1750_v35 = vpack.c.bf16 %v150_v31, %v148_v30  ;;  %v1752_v36 = vpack.c.bf16 %v155_v34, %v153_v33  ;;  %v154_v38 = vld [vmem:[%s2918_s3 + $0x70] sm:$0xff]  ;;  %v157_v39 = vld [vmem:[%s2918_s3 + $0x88] sm:$0xff] }
   0xa   :  { %1515 = vmatprep.subr.msk.mxu0 %vm60_vm0, %v43_v14  ;;  %v152_v37 = vld [vmem:[%s2918_s3 + $0x60] sm:$0xff]  ;;  %v159_v40 = vld [vmem:[%s2918_s3 + $0x98] sm:$0xff]  ;;  %v158_v44 = vld [vmem:[%s2918_s3 + $0x90] sm:$0xff] }
   0xb   :  { %v1754_v41 = vpack.c.bf16 %v154_v38, %v152_v37  ;;  %v1756_v42 = vpack.c.bf16 %v159_v40, %v157_v39  ;;  %v156_v43 = vld [vmem:[%s2918_s3 + $0x80] sm:$0xff]  ;;  %v161_v45 = vld [vmem:[%s2918_s3 + $0xa8] sm:$0xff]  ;;  %v163_v46 = vld [vmem:[%s2918_s3 + $0xb8] sm:$0xff] }
   0xc   :  { %1747 = vmatpush1.bf16.msra.mxu1 %v1746_v27  ;;  %v1758_v47 = vpack.c.bf16 %v158_v44, %v156_v43  ;;  %v1760_v48 = vpack.c.bf16 %v163_v46, %v161_v45  ;;  %v160_v49 = vld [vmem:[%s2918_s3 + $0xa0] sm:$0xff]  ;;  %v162_v50 = vld [vmem:[%s2918_s3 + $0xb0] sm:$0xff]  ;;  %v165_v51 = vld [vmem:[%s2918_s3 + $0xc8] sm:$0xff] }
   0xd   :  { %1516 = vmatpush1.msk.msra.mxu0 %vm60_vm0, %v42_v28  ;;  %1749 = vmatprep.subr.bf16.mxu1 %v1748_v29  ;;  %v167_v52 = vld [vmem:[%s2918_s3 + $0xd8] sm:$0xff]  ;;  %v1762_v53 = vpack.c.bf16 %v162_v50, %v160_v49  ;;  %v164_v55 = vld [vmem:[%s2918_s3 + $0xc0] sm:$0xff]  ;;  %v166_v56 = vld [vmem:[%s2918_s3 + $0xd0] sm:$0xff] }
   0xe   :  { %1517 = vmatmul.mubr.msk.f32.vlgmr.msra.gmra.mrb[0].mxu0 %vm56_vm1, %v33_v32  ;;  %v1764_v54 = vpack.c.bf16 %v167_v52, %v165_v51  ;;  %v169_v57 = vld [vmem:[%s2918_s3 + $0xe8] sm:$0xff]  ;;  %v171_v58 = vld [vmem:[%s2918_s3 + $0xf8] sm:$0xff]  ;;  %v1766_v59 = vpack.c.bf16 %v166_v56, %v164_v55  ;;  %v168_v61 = vld [vmem:[%s2918_s3 + $0xe0] sm:$0xff] }
   0xf   :  { %v1768_v60 = vpack.c.bf16 %v171_v58, %v169_v57  ;;  %v170_v62 = vld [vmem:[%s2918_s3 + $0xf0] sm:$0xff]  ;;  %v173_v63 = vld [vmem:[%s2918_s3 + $0x108] sm:$0xff]  ;;  %v175_v0 = vld [vmem:[%s2918_s3 + $0x118] sm:$0xff] }
  0x10   :  { %1751 = vmatpush1.bf16.msra.mxu1 %v1750_v35  ;;  %v1770_v1 = vpack.c.bf16 %v170_v62, %v168_v61  ;;  %v1772_v2 = vpack.c.bf16 %v175_v0, %v173_v63  ;;  %v172_v4 = vld [vmem:[%s2918_s3 + $0x100] sm:$0xff]  ;;  %v174_v5 = vld [vmem:[%s2918_s3 + $0x110] sm:$0xff]  ;;  %v177_v6 = vld [vmem:[%s2918_s3 + $0x128] sm:$0xff] }
  0x11   :  { %1753 = vmatprep.subr.bf16.mxu1 %v1752_v36  ;;  %v179_v7 = vld [vmem:[%s2918_s3 + $0x138] sm:$0xff]  ;;  %v1774_v8 = vpack.c.bf16 %v174_v5, %v172_v4  ;;  %v176_v10 = vld [vmem:[%s2918_s3 + $0x120] sm:$0xff]  ;;  %v178_v11 = vld [vmem:[%s2918_s3 + $0x130] sm:$0xff] }
  0x12   :  { %v1776_v9 = vpack.c.bf16 %v179_v7, %v177_v6  ;;  %v1778_v12 = vpack.c.bf16 %v178_v11, %v176_v10  ;;  %v181_v13 = vld [vmem:[%s2918_s3 + $0x148] sm:$0xff]  ;;  %v183_v14 = vld [vmem:[%s2918_s3 + $0x158] sm:$0xff]  ;;  %v180_v16 = vld [vmem:[%s2918_s3 + $0x140] sm:$0xff] }
  0x13   :  { %v1780_v15 = vpack.c.bf16 %v183_v14, %v181_v13  ;;  %v182_v17 = vld [vmem:[%s2918_s3 + $0x150] sm:$0xff]  ;;  %v185_v19 = vld [vmem:[%s2918_s3 + $0x168] sm:$0xf]  ;;  %v184_v20 = vld [vmem:[%s2918_s3 + $0x160] sm:$0xf] }
  0x14   :  { %1755 = vmatpush1.bf16.msra.mxu1 %v1754_v41  ;;  %v1782_v18 = vpack.c.bf16 %v182_v17, %v180_v16  ;;  %v283_v21 = vld [vmem:[%s2920_s5] sm:$0xff]  ;;  %v2177_v23 = vld [vmem:[%s2920_s5 + $0x8] sm:$0xff] }
  0x15   :  { %1757 = vmatprep.subr.bf16.mxu1 %v1756_v42  ;;  %v287_v22 = vld [vmem:[%s2920_s5 + $0x20] sm:$0xff]  ;;  %v2182_v26 = vld [vmem:[%s2920_s5 + $0x28] sm:$0xff] }
  0x16   :  { %v1521_v24 = vcombine.low %v283_v21, %v287_v22  ;;  %v1522_v25 = vcombine.high %v283_v21, %v287_v22  ;;  %v291_v27 = vld [vmem:[%s2920_s5 + $0x40] sm:$0xff]  ;;  %v1523_v29 = vcombine.low %v2177_v23, %v2182_v26  ;;  %v1524_v30 = vcombine.high %v2177_v23, %v2182_v26  ;;  %v292_v13 = vld [vmem:[%s2920_s5 + $0x48] sm:$0xff] }
  0x17   :  { %v295_v28 = vld [vmem:[%s2920_s5 + $0x60] sm:$0xff]  ;;  %v296_v14 = vld [vmem:[%s2920_s5 + $0x68] sm:$0xff] }
  0x18   :  { %1759 = vmatpush1.bf16.msra.mxu1 %v1758_v47  ;;  %v1530_v31 = vcombine.high %v291_v27, %v295_v28  ;;  %905 = vmatprep.subr.bf16.mxu0 %v1522_v25  ;;  %v1529_v32 = vcombine.low %v291_v27, %v295_v28  ;;  %v299_v33 = vld [vmem:[%s2920_s5 + $0x80] sm:$0xff]  ;;  %v1532_v17 = vcombine.high %v292_v13, %v296_v14  ;;  %v308_v22 = vld [vmem:[%s2920_s5 + $0xc8] sm:$0xff] }
  0x19   :  { %1761 = vmatprep.subr.bf16.mxu1 %v1760_v48  ;;  %906 = vmatpush1.bf16.msra.mxu0 %v1521_v24  ;;  %v303_v34 = vld [vmem:[%s2920_s5 + $0xa0] sm:$0xff]  ;;  %v312_v24 = vld [vmem:[%s2920_s5 + $0xe8] sm:$0xff] }
  0x1a   :  { %907 = vmatprep.subr.bf16.mxu0 %v1530_v31  ;;  %v1538_v35 = vcombine.high %v299_v33, %v303_v34  ;;  %v1537_v36 = vcombine.low %v299_v33, %v303_v34  ;;  %v307_v37 = vld [vmem:[%s2920_s5 + $0xc0] sm:$0xff]  ;;  %v1548_v27 = vcombine.high %v308_v22, %v312_v24  ;;  %v316_v23 = vld [vmem:[%s2920_s5 + $0x108] sm:$0xff]  ;;  %v1547_v28 = vcombine.low %v308_v22, %v312_v24 }
  0x1b   :  { %v311_v38 = vld [vmem:[%s2920_s5 + $0xe0] sm:$0xff]  ;;  %v320_v26 = vld [vmem:[%s2920_s5 + $0x128] sm:$0xff] }
  0x1c   :  { %1763 = vmatpush1.bf16.msra.mxu1 %v1762_v53  ;;  %v1546_v39 = vcombine.high %v307_v37, %v311_v38  ;;  %v1545_v40 = vcombine.low %v307_v37, %v311_v38  ;;  %v315_v41 = vld [vmem:[%s2920_s5 + $0x100] sm:$0xff]  ;;  %v328_v31 = vld [vmem:[%s2920_s5 + $0x168] sm:$0xff] }
  0x1d   :  { %1765 = vmatprep.subr.bf16.mxu1 %v1764_v54  ;;  %908 = vmatpush1.bf16.msra.mxu0 %v1529_v32  ;;  %v319_v42 = vld [vmem:[%s2920_s5 + $0x120] sm:$0xff]  ;;  %v1555_v32 = vcombine.low %v316_v23, %v320_v26  ;;  %v332_v34 = vld [vmem:[%s2920_s5 + $0x188] sm:$0xff] }
  0x1e   :  { %909 = vmatprep.subr.bf16.mxu0 %v1538_v35  ;;  %v1554_v43 = vcombine.high %v315_v41, %v319_v42  ;;  %v1553_v44 = vcombine.low %v315_v41, %v319_v42  ;;  %v323_v45 = vld [vmem:[%s2920_s5 + $0x140] sm:$0xff]  ;;  %v336_v35 = vld [vmem:[%s2920_s5 + $0x1a8] sm:$0xff] }
  0x1f   :  { %v327_v46 = vld [vmem:[%s2920_s5 + $0x160] sm:$0xff]  ;;  %v1572_v37 = vcombine.high %v332_v34, %v336_v35  ;;  %v340_v38 = vld [vmem:[%s2920_s5 + $0x1c8] sm:$0xff] }
  0x20   :  { %1767 = vmatpush1.bf16.msra.mxu1 %v1766_v59  ;;  %v1562_v47 = vcombine.high %v323_v45, %v327_v46  ;;  %v1561_v48 = vcombine.low %v323_v45, %v327_v46  ;;  %v331_v49 = vld [vmem:[%s2920_s5 + $0x180] sm:$0xff]  ;;  %v348_v42 = vld [vmem:[%s2920_s5 + $0x208] sm:$0xff] }
  0x21   :  { %1769 = vmatprep.subr.bf16.mxu1 %v1768_v60  ;;  %910 = vmatpush1.bf16.msra.mxu0 %v1537_v36  ;;  %v335_v50 = vld [vmem:[%s2920_s5 + $0x1a0] sm:$0xff]  ;;  %v356_v46 = vld [vmem:[%s2920_s5 + $0x248] sm:$0xff] }
  0x22   :  { %911 = vmatprep.subr.bf16.mxu0 %v1546_v39  ;;  %v1570_v51 = vcombine.high %v331_v49, %v335_v50  ;;  %v1569_v52 = vcombine.low %v331_v49, %v335_v50  ;;  %v339_v53 = vld [vmem:[%s2920_s5 + $0x1c0] sm:$0xff]  ;;  %v344_v39 = vld [vmem:[%s2920_s5 + $0x1e8] sm:$0xff] }
  0x23   :  { %v343_v54 = vld [vmem:[%s2920_s5 + $0x1e0] sm:$0xff]  ;;  %v1580_v41 = vcombine.high %v340_v38, %v344_v39 }
  0x24   :  { %1771 = vmatpush1.bf16.msra.mxu1 %v1770_v1  ;;  %v1578_v55 = vcombine.high %v339_v53, %v343_v54  ;;  %v1577_v56 = vcombine.low %v339_v53, %v343_v54  ;;  %v347_v57 = vld [vmem:[%s2920_s5 + $0x200] sm:$0xff]  ;;  %v46_v1 = vlaneseq  ;;  %v364_v53 = vld [vmem:[%s2920_s5 + $0x288] sm:$0xff] }
  0x25   :  { %1773 = vmatprep.subr.bf16.mxu1 %v1772_v2  ;;  %912 = vmatpush1.bf16.msra.mxu0 %v1545_v40  ;;  %v351_v58 = vld [vmem:[%s2920_s5 + $0x220] sm:$0xff]  ;;  %v1571_v40 = vcombine.low %v332_v34, %v336_v35  ;;  %v305_v34 = vld [vmem:[%s2920_s5 + $0xb0] sm:$0xff]  ;;  %v302_v35 = vld [vmem:[%s2920_s5 + $0x98] sm:$0xff] }
  0x26   :  { %913 = vmatprep.subr.bf16.mxu0 %v1554_v43  ;;  %v1586_v59 = vcombine.high %v347_v57, %v351_v58  ;;  %v1585_v60 = vcombine.low %v347_v57, %v351_v58  ;;  %v355_v61 = vld [vmem:[%s2920_s5 + $0x240] sm:$0xff]  ;;  %v2243_v2 = vshrl.u32 %v46_v1, 7  ;;  %v352_v43 = vld [vmem:[%s2920_s5 + $0x228] sm:$0xff] }
  0x27   :  { %v359_v62 = vld [vmem:[%s2920_s5 + $0x260] sm:$0xff]  ;;  %v1588_v45 = vcombine.high %v348_v42, %v352_v43 }
  0x28   :  { %1775 = vmatpush1.bf16.msra.mxu1 %v1774_v8  ;;  %v1594_v63 = vcombine.high %v355_v61, %v359_v62  ;;  %v1593_v0 = vcombine.low %v355_v61, %v359_v62  ;;  %v2246_v4 = vsub.s32 0, %v2243_v2  ;;  %v44_v5 = vld [vmem:[%s2921_s2] sm:$0x3]  ;;  %v2252_v6 = vsub.s32 1, %v2243_v2 }
  0x29   :  { %1777 = vmatprep.subr.bf16.mxu1 %v1776_v9  ;;  %914 = vmatpush1.bf16.msra.mxu0 %v1553_v44  ;;  %v1579_v44 = vcombine.low %v340_v38, %v344_v39 }
  0x2a   :  { %915 = vmatprep.subr.bf16.mxu0 %v1562_v47  ;;  %v49_v7 = vrot.slane %v44_v5, %v2246_v4  ;;  %v53_v8 = vrot.slane %v44_v5, %v2252_v6  ;;  %v360_v47 = vld [vmem:[%s2920_s5 + $0x268] sm:$0xff] }
  0x2b   :  { %v1596_v49 = vcombine.high %v356_v46, %v360_v47  ;;  %v1595_v50 = vcombine.low %v356_v46, %v360_v47 }
  0x2c   :  { %1779 = vmatpush1.bf16.msra.mxu1 %v1778_v12 }
  0x2d   :  { %1781 = vmatprep.subr.bf16.mxu1 %v1780_v15  ;;  %916 = vmatpush1.bf16.msra.mxu0 %v1561_v48  ;;  %v1587_v48 = vcombine.low %v348_v42, %v352_v43  ;;  %v313_v42 = vld [vmem:[%s2920_s5 + $0xf0] sm:$0xff]  ;;  %v310_v43 = vld [vmem:[%s2920_s5 + $0xd8] sm:$0xff] }
  0x2e   :  { %917 = vmatprep.subr.bf16.mxu0 %v1570_v51  ;;  %v363_v51 = vld [vmem:[%s2920_s5 + $0x280] sm:$0xff] }
  0x30   :  { %1783 = vmatpush1.bf16.msra.mxu1 %v1782_v18  ;;  %v300_v18 = vld [vmem:[%s2920_s5 + $0x88] sm:$0xff] }
  0x31   :  { %1518 = vmatprep.subr.msk.mxu1 %vm60_vm0, %v185_v19  ;;  %918 = vmatpush1.bf16.msra.mxu0 %v1569_v52  ;;  %v304_v19 = vld [vmem:[%s2920_s5 + $0xa8] sm:$0xff]  ;;  %v367_v52 = vld [vmem:[%s2920_s5 + $0x2a0] sm:$0xff] }
  0x32   :  { %919 = vmatprep.subr.bf16.mxu0 %v1578_v55  ;;  %v1540_v21 = vcombine.high %v300_v18, %v304_v19  ;;  %v1539_v25 = vcombine.low %v300_v18, %v304_v19  ;;  %v1602_v54 = vcombine.high %v363_v51, %v367_v52  ;;  %v368_v55 = vld [vmem:[%s2920_s5 + $0x2a8] sm:$0xff] }
  0x33   :  { %v1603_v57 = vcombine.low %v364_v53, %v368_v55  ;;  %v1604_v58 = vcombine.high %v364_v53, %v368_v55 }
  0x34   :  { %1519 = vmatpush1.msk.msra.mxu1 %vm60_vm0, %v184_v20  ;;  %v1531_v20 = vcombine.low %v292_v13, %v296_v14 }
  0x35   :  { %946 = vmatprep.subr.bf16.mxu1 %v1524_v30  ;;  %920 = vmatpush1.bf16.msra.mxu0 %v1577_v56  ;;  %v324_v30 = vld [vmem:[%s2920_s5 + $0x148] sm:$0xff]  ;;  %v1601_v56 = vcombine.low %v363_v51, %v367_v52  ;;  %v318_v51 = vld [vmem:[%s2920_s5 + $0x118] sm:$0xff] }
  0x36   :  { %921 = vmatprep.subr.bf16.mxu0 %v1586_v59  ;;  %v1564_v33 = vcombine.high %v324_v30, %v328_v31  ;;  %v1563_v36 = vcombine.low %v324_v30, %v328_v31  ;;  %v371_v59 = vld [vmem:[%s2920_s5 + $0x2c0] sm:$0x33]  ;;  %v301_v31 = vld [vmem:[%s2920_s5 + $0x90] sm:$0xff]  ;;  %v322_v52 = vld [vmem:[%s2920_s5 + $0x138] sm:$0xff] }
  0x37   :  { %v1610_v61 = vcombine.high %v371_v59, %v371_v59  ;;  %v1542_v39 = vcombine.high %v301_v31, %v305_v34 }
  0x39   :  { %922 = vmatpush1.bf16.msra.mxu0 %v1585_v60  ;;  %v372_v60 = vld [vmem:[%s2920_s5 + $0x2c8] sm:$0x33] }
  0x3a   :  { %923 = vmatprep.subr.bf16.mxu0 %v1594_v63  ;;  %v1612_v62 = vcombine.high %v372_v60, %v372_v60  ;;  %v1609_v63 = vcombine.low %v371_v59, %v371_v59  ;;  %v326_v59 = vld [vmem:[%s2920_s5 + $0x158] sm:$0xff] }
  0x3c   :  { %v882_v5 = vsel %vm880_vm3, %v1609_v63, 0 }
  0x3d   :  { %924 = vmatpush1.bf16.msra.mxu0 %v1593_v0  ;;  %v1611_v0 = vcombine.low %v372_v60, %v372_v60  ;;  %v330_v60 = vld [vmem:[%s2920_s5 + $0x178] sm:$0xff] }
  0x3e   :  { %925 = vmatprep.subr.bf16.mxu0 %v1602_v54 }
  0x41   :  { %926 = vmatpush1.bf16.msra.mxu0 %v1601_v56  ;;  %v1560_v56 = vcombine.high %v318_v51, %v322_v52 }
  0x42   :  { %1617 = vmatprep.subr.msk.bf16.mxu0 %vm880_vm3, %v1610_v61 }
  0x45   :  { %928 = vmatpush1.bf16.msra.mxu0 %v882_v5  ;;  %v333_v5 = vld [vmem:[%s2920_s5 + $0x190] sm:$0xff] }
  0xe1   :  { %v133_v9 = vpop.f32.mrb[0].mxu0 }
  0xe2   :  { %v134_v10 = vadd.f32 %v133_v9, %v49_v7  ;;  %v135_v11 = vpop.f32.mrb[1].mxu0  ;;  %v888_v7 = vsel %vm880_vm3, %v1611_v0, 0  ;;  %v289_v9 = vld [vmem:[%s2920_s5 + $0x30] sm:$0xff]  ;;  %v1568_v0 = vcombine.high %v326_v59, %v330_v60 }
  0xe3   :  { %v136_v12 = vadd.f32 %v135_v11, %v53_v8  ;;  %v285_v8 = vld [vmem:[%s2920_s5 + $0x10] sm:$0xff] }
  0xe4   :  { %v138_v16 = vmax.f32 %v134_v10, 0.0  ;;  %v286_v10 = vld [vmem:[%s2920_s5 + $0x18] sm:$0xff]  ;;  %v1526_v11 = vcombine.high %v285_v8, %v289_v9  ;;  %v1525_v13 = vcombine.low %v285_v8, %v289_v9 }
  0xe5   :  { %v139_v15 = vmax.f32 %v136_v12, 0.0  ;;  %v290_v12 = vld [vmem:[%s2920_s5 + $0x38] sm:$0xff] }
  0xe6   :  { %v1527_v14 = vcombine.low %v286_v10, %v290_v12  ;;  %987 = vmatprep.subr.bf16.mxu0 %v1526_v11  ;;  %v334_v8 = vld [vmem:[%s2920_s5 + $0x198] sm:$0xff]  ;;  %v1567_v11 = vcombine.low %v326_v59, %v330_v60  ;;  %v1101_v59 = vld [vmem:[%s2923_s7 + $0x100] sm:$0xff]  ;;  %v1102_v60 = vld [vmem:[%s2923_s7 + $0x108] sm:$0xff] }
  0xe7   :  { %1520 = vmatprep.mubr.msk.f32.mxu1 %vm198_vm2, %v139_v15  ;;  %v1528_v15 = vcombine.high %v286_v10, %v290_v12  ;;  %v338_v9 = vld [vmem:[%s2920_s5 + $0x1b8] sm:$0xff] }
  0xe8   :  { %273 = vmatmul.mubr.f32.vlgmr.msra.gmra.mrb[0].mxu1 %v138_v16  ;;  %v186_v16 = vld [vmem:[%s2922_s4] sm:$0x3] }
  0xe9   :  { %947 = vmatpush1.bf16.msra.mxu1 %v1523_v29  ;;  %v1556_v29 = vcombine.high %v316_v23, %v320_v26  ;;  %v195_v18 = vrot.slane %v186_v16, %v2252_v6  ;;  %v297_v23 = vld [vmem:[%s2920_s5 + $0x70] sm:$0xff]  ;;  %v294_v26 = vld [vmem:[%s2920_s5 + $0x58] sm:$0xff] }
  0xea   :  { %948 = vmatprep.subr.bf16.mxu1 %v1532_v17  ;;  %v191_v17 = vrot.slane %v186_v16, %v2246_v4  ;;  %v342_v16 = vld [vmem:[%s2920_s5 + $0x1d8] sm:$0xff] }
  0xed   :  { %949 = vmatpush1.bf16.msra.mxu1 %v1531_v20 }
  0xee   :  { %950 = vmatprep.subr.bf16.mxu1 %v1540_v21 }
  0xf1   :  { %951 = vmatpush1.bf16.msra.mxu1 %v1539_v25 }
  0xf2   :  { %952 = vmatprep.subr.bf16.mxu1 %v1548_v27  ;;  %v293_v27 = vld [vmem:[%s2920_s5 + $0x50] sm:$0xff] }
  0xf5   :  { %953 = vmatpush1.bf16.msra.mxu1 %v1547_v28  ;;  %v298_v28 = vld [vmem:[%s2920_s5 + $0x78] sm:$0xff] }
  0xf6   :  { %954 = vmatprep.subr.bf16.mxu1 %v1556_v29  ;;  %v1535_v38 = vcombine.low %v294_v26, %v298_v28 }
  0xf9   :  { %955 = vmatpush1.bf16.msra.mxu1 %v1555_v32  ;;  %v1534_v32 = vcombine.high %v293_v27, %v297_v23 }
  0xfa   :  { %956 = vmatprep.subr.bf16.mxu1 %v1564_v33  ;;  %v1536_v33 = vcombine.high %v294_v26, %v298_v28 }
  0xfd   :  { %957 = vmatpush1.bf16.msra.mxu1 %v1563_v36  ;;  %v306_v36 = vld [vmem:[%s2920_s5 + $0xb8] sm:$0xff] }
  0xfe   :  { %958 = vmatprep.subr.bf16.mxu1 %v1572_v37  ;;  %v1533_v37 = vcombine.low %v293_v27, %v297_v23  ;;  %v1543_v46 = vcombine.low %v302_v35, %v306_v36  ;;  %v354_v27 = vld [vmem:[%s2920_s5 + $0x238] sm:$0xff] }
 0x101   :  { %959 = vmatpush1.bf16.msra.mxu1 %v1571_v40  ;;  %v1544_v40 = vcombine.high %v302_v35, %v306_v36 }
 0x102   :  { %960 = vmatprep.subr.bf16.mxu1 %v1580_v41  ;;  %v309_v41 = vld [vmem:[%s2920_s5 + $0xd0] sm:$0xff] }
 0x103   :  { %v1550_v47 = vcombine.high %v309_v41, %v313_v42  ;;  %v1549_v53 = vcombine.low %v309_v41, %v313_v42  ;;  %v366_v41 = vld [vmem:[%s2920_s5 + $0x298] sm:$0xff] }
 0x104   :  { %v370_v42 = vld [vmem:[%s2920_s5 + $0x2b8] sm:$0xff] }
 0x105   :  { %961 = vmatpush1.bf16.msra.mxu1 %v1579_v44  ;;  %v314_v44 = vld [vmem:[%s2920_s5 + $0xf8] sm:$0xff] }
 0x106   :  { %962 = vmatprep.subr.bf16.mxu1 %v1588_v45  ;;  %v1541_v45 = vcombine.low %v301_v31, %v305_v34  ;;  %v1551_v54 = vcombine.low %v310_v43, %v314_v44  ;;  %v357_v31 = vld [vmem:[%s2920_s5 + $0x250] sm:$0xff]  ;;  %v362_v34 = vld [vmem:[%s2920_s5 + $0x278] sm:$0xff] }
 0x109   :  { %963 = vmatpush1.bf16.msra.mxu1 %v1587_v48  ;;  %v1552_v48 = vcombine.high %v310_v43, %v314_v44 }
 0x10a   :  { %964 = vmatprep.subr.bf16.mxu1 %v1596_v49  ;;  %v317_v49 = vld [vmem:[%s2920_s5 + $0x110] sm:$0xff] }
 0x10d   :  { %965 = vmatpush1.bf16.msra.mxu1 %v1595_v50  ;;  %v321_v50 = vld [vmem:[%s2920_s5 + $0x130] sm:$0xff] }
 0x10e   :  { %966 = vmatprep.subr.bf16.mxu1 %v1604_v58  ;;  %v1558_v55 = vcombine.high %v317_v49, %v321_v50  ;;  %v329_v58 = vld [vmem:[%s2920_s5 + $0x170] sm:$0xff]  ;;  %v1557_v61 = vcombine.low %v317_v49, %v321_v50  ;;  %v1607_v50 = vcombine.low %v366_v41, %v370_v42 }
 0x111   :  { %967 = vmatpush1.bf16.msra.mxu1 %v1603_v57  ;;  %v325_v57 = vld [vmem:[%s2920_s5 + $0x150] sm:$0xff] }
 0x112   :  { %1619 = vmatprep.subr.msk.bf16.mxu1 %vm880_vm3, %v1612_v62  ;;  %v1559_v62 = vcombine.low %v318_v51, %v322_v52  ;;  %v1566_v63 = vcombine.high %v325_v57, %v329_v58  ;;  %v1565_v10 = vcombine.low %v325_v57, %v329_v58  ;;  %v1085_v57 = vld [vmem:[%s2923_s7 + $0x80] sm:$0xff]  ;;  %v1086_v58 = vld [vmem:[%s2923_s7 + $0x88] sm:$0xff] }
 0x115   :  { %969 = vmatpush1.bf16.msra.mxu1 %v888_v7  ;;  %v337_v7 = vld [vmem:[%s2920_s5 + $0x1b0] sm:$0xff] }
 0x116   :  { %1028 = vmatprep.subr.bf16.mxu1 %v1528_v15  ;;  %v1574_v12 = vcombine.high %v333_v5, %v337_v7  ;;  %v345_v15 = vld [vmem:[%s2920_s5 + $0x1f0] sm:$0xff] }
 0x1bb   :  { %v274_v19 = vpop.f32.mrb[0].mxu1 }
 0x1bc   :  { %v275_v20 = vadd.f32 %v274_v19, %v191_v17  ;;  %v276_v21 = vpop.f32.mrb[1].mxu1  ;;  %v346_v17 = vld [vmem:[%s2920_s5 + $0x1f8] sm:$0xff]  ;;  %v1575_v19 = vcombine.low %v334_v8, %v338_v9 }
 0x1bd   :  { %v277_v22 = vadd.f32 %v276_v21, %v195_v18  ;;  %v1573_v18 = vcombine.low %v333_v5, %v337_v7  ;;  %v1584_v21 = vcombine.high %v342_v16, %v346_v17  ;;  %v1583_v26 = vcombine.low %v342_v16, %v346_v17  ;;  %v1069_v5 = vld [vmem:[%s2923_s7] sm:$0xff]  ;;  %v1070_v7 = vld [vmem:[%s2923_s7 + $0x8] sm:$0xff] }
 0x1be   :  { %v279_v24 = vmax.f32 %v275_v20, 0.0 }
 0x1bf   :  { %v280_v25 = vmax.f32 %v277_v22, 0.0  ;;  %v349_v22 = vld [vmem:[%s2920_s5 + $0x210] sm:$0xff] }
 0x1c0   :  { %v2365_v30 = vpack.c.bf16 %v279_v24, %v279_v24  ;;  %v353_v24 = vld [vmem:[%s2920_s5 + $0x230] sm:$0xff] }
 0x1c1   :  { %v282_v29 = vpack.c.bf16 %v280_v25, %v280_v25  ;;  %v350_v25 = vld [vmem:[%s2920_s5 + $0x218] sm:$0xff]  ;;  %v1590_v28 = vcombine.high %v349_v22, %v353_v24  ;;  %v1589_v35 = vcombine.low %v349_v22, %v353_v24  ;;  %v1089_v22 = vld [vmem:[%s2923_s7 + $0xa0] sm:$0xff]  ;;  %v1090_v24 = vld [vmem:[%s2923_s7 + $0xa8] sm:$0xff] }
 0x1c2   :  { %v1591_v36 = vcombine.low %v350_v25, %v354_v27 }
 0x1c3   :  { %1618 = vmatprep.mubr.msk.bf16.mxu0 %vm198_vm2, %v282_v29  ;;  %1620 = vmatprep.mubr.msk.bf16.mxu1 %vm198_vm2, %v282_v29 }
 0x1c4   :  { %938 = vmatmul.mubr.bf16.vlgmr.msra.gmra.mrb[4].mxu0 %v2365_v30  ;;  %979 = vmatmul.mubr.bf16.vlgmr.msra.gmra.mrb[4].mxu1 %v2365_v30 }
 0x1c5   :  { %988 = vmatpush1.bf16.msra.mxu0 %v1525_v13  ;;  %1029 = vmatpush1.bf16.msra.mxu1 %v1527_v14  ;;  %v1576_v13 = vcombine.high %v334_v8, %v338_v9  ;;  %v341_v14 = vld [vmem:[%s2920_s5 + $0x1d0] sm:$0xff]  ;;  %v1120_v9 = vld [vmem:[%s2923_s7 + $0x198] sm:$0xff] }
 0x1c6   :  { %1622 = vmatprep.mubr.msk.bf16.mxu0 %vm198_vm2, %v282_v29  ;;  %1624 = vmatprep.mubr.msk.bf16.mxu1 %vm198_vm2, %v282_v29  ;;  %v1582_v20 = vcombine.high %v341_v14, %v345_v15  ;;  %v1581_v23 = vcombine.low %v341_v14, %v345_v15  ;;  %v1592_v29 = vcombine.high %v350_v25, %v354_v27  ;;  %v1119_v8 = vld [vmem:[%s2923_s7 + $0x190] sm:$0xff]  ;;  %v1104_v15 = vld [vmem:[%s2923_s7 + $0x118] sm:$0xff] }
 0x1c7   :  { %989 = vmatprep.subr.bf16.mxu0 %v1534_v32  ;;  %1030 = vmatprep.subr.bf16.mxu1 %v1536_v33  ;;  %v361_v32 = vld [vmem:[%s2920_s5 + $0x270] sm:$0xff]  ;;  %v358_v33 = vld [vmem:[%s2920_s5 + $0x258] sm:$0xff]  ;;  %v1820_v16 = vpack.c.bf16 %v1120_v9, %v1119_v8  ;;  %v1129_v9 = vld [vmem:[%s2923_s7 + $0x1e0] sm:$0xff] }
 0x1c8   :  { %v1597_v43 = vcombine.low %v357_v31, %v361_v32  ;;  %v1599_v44 = vcombine.low %v358_v33, %v362_v34  ;;  %v1103_v14 = vld [vmem:[%s2923_s7 + $0x110] sm:$0xff]  ;;  %v1080_v8 = vld [vmem:[%s2923_s7 + $0x58] sm:$0xff] }
 0x1c9   :  { %990 = vmatpush1.bf16.msra.mxu0 %v1533_v37  ;;  %1031 = vmatpush1.bf16.msra.mxu1 %v1535_v38  ;;  %v1598_v37 = vcombine.high %v357_v31, %v361_v32  ;;  %v1600_v38 = vcombine.high %v358_v33, %v362_v34  ;;  %v1822_v25 = vpack.c.bf16 %v1104_v15, %v1103_v14  ;;  %v1074_v31 = vld [vmem:[%s2923_s7 + $0x28] sm:$0xff]  ;;  %v1123_v32 = vld [vmem:[%s2923_s7 + $0x1b0] sm:$0xff]  ;;  %v1124_v33 = vld [vmem:[%s2923_s7 + $0x1b8] sm:$0xff] }
 0x1ca   :  { %991 = vmatprep.subr.bf16.mxu0 %v1542_v39  ;;  %1032 = vmatprep.subr.bf16.mxu1 %v1544_v40  ;;  %v365_v39 = vld [vmem:[%s2920_s5 + $0x290] sm:$0xff]  ;;  %v1113_v15 = vld [vmem:[%s2923_s7 + $0x160] sm:$0xff] }
 0x1cb   :  { %v369_v40 = vld [vmem:[%s2920_s5 + $0x2b0] sm:$0xff] }
 0x1cc   :  { %v1605_v49 = vcombine.low %v365_v39, %v369_v40  ;;  %v1091_v34 = vld [vmem:[%s2923_s7 + $0xb0] sm:$0xff] }
 0x1cd   :  { %992 = vmatpush1.bf16.msra.mxu0 %v1541_v45  ;;  %1033 = vmatpush1.bf16.msra.mxu1 %v1543_v46  ;;  %v1606_v45 = vcombine.high %v365_v39, %v369_v40  ;;  %v1608_v46 = vcombine.high %v366_v41, %v370_v42  ;;  %v1108_v39 = vld [vmem:[%s2923_s7 + $0x138] sm:$0xff]  ;;  %v1828_v40 = vpack.c.bf16 %v1124_v33, %v1123_v32  ;;  %v1075_v42 = vld [vmem:[%s2923_s7 + $0x30] sm:$0xff] }
 0x1ce   :  { %993 = vmatprep.subr.bf16.mxu0 %v1550_v47  ;;  %1034 = vmatprep.subr.bf16.mxu1 %v1552_v48  ;;  %v373_v47 = vld [vmem:[%s2920_s5 + $0x2d0] sm:$0x33]  ;;  %v374_v48 = vld [vmem:[%s2920_s5 + $0x2d8] sm:$0x33] }
 0x1cf   :  { %v1614_v51 = vcombine.high %v373_v47, %v373_v47  ;;  %v1616_v52 = vcombine.high %v374_v48, %v374_v48  ;;  %v1084_v32 = vld [vmem:[%s2923_s7 + $0x78] sm:$0xff] }
 0x1d1   :  { %994 = vmatpush1.bf16.msra.mxu0 %v1549_v53  ;;  %1035 = vmatpush1.bf16.msra.mxu1 %v1551_v54  ;;  %v1613_v53 = vcombine.low %v373_v47, %v373_v47  ;;  %v1615_v54 = vcombine.low %v374_v48, %v374_v48  ;;  %v1094_v47 = vld [vmem:[%s2923_s7 + $0xc8] sm:$0xff] }
 0x1d2   :  { %995 = vmatprep.subr.bf16.mxu0 %v1558_v55  ;;  %1036 = vmatprep.subr.bf16.mxu1 %v1560_v56  ;;  %v1117_v55 = vld [vmem:[%s2923_s7 + $0x180] sm:$0xff]  ;;  %v1118_v56 = vld [vmem:[%s2923_s7 + $0x188] sm:$0xff] }
 0x1d5   :  { %996 = vmatpush1.bf16.msra.mxu0 %v1557_v61  ;;  %1037 = vmatpush1.bf16.msra.mxu1 %v1559_v62  ;;  %v894_v61 = vsel %vm880_vm3, %v1613_v53, 0  ;;  %v900_v62 = vsel %vm880_vm3, %v1615_v54, 0  ;;  %v1077_v54 = vld [vmem:[%s2923_s7 + $0x40] sm:$0xff] }
 0x1d6   :  { %997 = vmatprep.subr.bf16.mxu0 %v1566_v63  ;;  %1038 = vmatprep.subr.bf16.mxu1 %v1568_v0  ;;  %v1816_v63 = vpack.c.bf16 %v1118_v56, %v1117_v55  ;;  %v1784_v0 = vpack.c.bf16 %v1086_v58, %v1085_v57  ;;  %v1078_v55 = vld [vmem:[%s2923_s7 + $0x48] sm:$0xff]  ;;  %v1127_v56 = vld [vmem:[%s2923_s7 + $0x1d0] sm:$0xff]  ;;  %v1128_v57 = vld [vmem:[%s2923_s7 + $0x1d8] sm:$0xff] }
 0x1d7   :  { %v1095_v58 = vld [vmem:[%s2923_s7 + $0xd0] sm:$0xff] }
 0x1d9   :  { %998 = vmatpush1.bf16.msra.mxu0 %v1565_v10  ;;  %1039 = vmatpush1.bf16.msra.mxu1 %v1567_v11  ;;  %v1087_v10 = vld [vmem:[%s2923_s7 + $0x90] sm:$0xff]  ;;  %v1088_v11 = vld [vmem:[%s2923_s7 + $0x98] sm:$0xff] }
 0x1da   :  { %999 = vmatprep.subr.bf16.mxu0 %v1574_v12  ;;  %1040 = vmatprep.subr.bf16.mxu1 %v1576_v13  ;;  %v1818_v12 = vpack.c.bf16 %v1102_v60, %v1101_v59  ;;  %v1786_v13 = vpack.c.bf16 %v1070_v7, %v1069_v5  ;;  %v1788_v17 = vpack.c.bf16 %v1088_v11, %v1087_v10  ;;  %v1096_v59 = vld [vmem:[%s2923_s7 + $0xd8] sm:$0xff]  ;;  %v1079_v7 = vld [vmem:[%s2923_s7 + $0x50] sm:$0xff]  ;;  %v1130_v10 = vld [vmem:[%s2923_s7 + $0x1e8] sm:$0xff] }
 0x1db   :  { %v1804_v5 = vpack.c.bf16 %v1096_v59, %v1095_v58  ;;  %v1097_v11 = vld [vmem:[%s2923_s7 + $0xe0] sm:$0xff]  ;;  %v1806_v14 = vpack.c.bf16 %v1080_v8, %v1079_v7  ;;  %v1167_v59 = vld [vmem:[%s2923_s7 + $0x310] sm:$0xff] }
 0x1dc   :  { %v1135_v8 = vld [vmem:[%s2923_s7 + $0x210] sm:$0xff] }
 0x1dd   :  { %1000 = vmatpush1.bf16.msra.mxu0 %v1573_v18  ;;  %1041 = vmatpush1.bf16.msra.mxu1 %v1575_v19  ;;  %v1071_v18 = vld [vmem:[%s2923_s7 + $0x10] sm:$0xff]  ;;  %v1072_v19 = vld [vmem:[%s2923_s7 + $0x18] sm:$0xff] }
 0x1de   :  { %1001 = vmatprep.subr.bf16.mxu0 %v1582_v20  ;;  %1042 = vmatprep.subr.bf16.mxu1 %v1584_v21  ;;  %v1121_v20 = vld [vmem:[%s2923_s7 + $0x1a0] sm:$0xff]  ;;  %v1122_v21 = vld [vmem:[%s2923_s7 + $0x1a8] sm:$0xff]  ;;  %v1790_v27 = vpack.c.bf16 %v1072_v19, %v1071_v18 }
 0x1df   :  { %v1114_v18 = vld [vmem:[%s2923_s7 + $0x168] sm:$0xff]  ;;  %v1081_v19 = vld [vmem:[%s2923_s7 + $0x60] sm:$0xff] }
 0x1e1   :  { %1002 = vmatpush1.bf16.msra.mxu0 %v1581_v23  ;;  %1043 = vmatpush1.bf16.msra.mxu1 %v1583_v26  ;;  %v1105_v23 = vld [vmem:[%s2923_s7 + $0x120] sm:$0xff]  ;;  %v1106_v26 = vld [vmem:[%s2923_s7 + $0x128] sm:$0xff] }
 0x1e2   :  { %1003 = vmatprep.subr.bf16.mxu0 %v1590_v28  ;;  %1044 = vmatprep.subr.bf16.mxu1 %v1592_v29  ;;  %v1824_v28 = vpack.c.bf16 %v1122_v21, %v1121_v20  ;;  %v1792_v29 = vpack.c.bf16 %v1090_v24, %v1089_v22  ;;  %v1082_v20 = vld [vmem:[%s2923_s7 + $0x68] sm:$0xff]  ;;  %v1842_v21 = vpack.c.bf16 %v1114_v18, %v1113_v15  ;;  %v1131_v24 = vld [vmem:[%s2923_s7 + $0x1f0] sm:$0xff] }
 0x1e3   :  { %v1810_v22 = vpack.c.bf16 %v1082_v20, %v1081_v19  ;;  %v1170_v15 = vld [vmem:[%s2923_s7 + $0x328] sm:$0xff]  ;;  %v1155_v19 = vld [vmem:[%s2923_s7 + $0x2b0] sm:$0xff]  ;;  %v1156_v20 = vld [vmem:[%s2923_s7 + $0x2b8] sm:$0xff] }
 0x1e4   :  { %v1138_v18 = vld [vmem:[%s2923_s7 + $0x228] sm:$0xff] }
 0x1e5   :  { %1004 = vmatpush1.bf16.msra.mxu0 %v1589_v35  ;;  %1045 = vmatpush1.bf16.msra.mxu1 %v1591_v36  ;;  %v1092_v35 = vld [vmem:[%s2923_s7 + $0xb8] sm:$0xff]  ;;  %v1826_v36 = vpack.c.bf16 %v1106_v26, %v1105_v23  ;;  %v1099_v23 = vld [vmem:[%s2923_s7 + $0xf0] sm:$0xff] }
 0x1e6   :  { %1005 = vmatprep.subr.bf16.mxu0 %v1598_v37  ;;  %1046 = vmatprep.subr.bf16.mxu1 %v1600_v38  ;;  %v1107_v38 = vld [vmem:[%s2923_s7 + $0x130] sm:$0xff]  ;;  %v1796_v41 = vpack.c.bf16 %v1092_v35, %v1091_v34  ;;  %v1100_v26 = vld [vmem:[%s2923_s7 + $0xf8] sm:$0xff]  ;;  %v1941_v35 = vmov 0.0|0.0  }
 0x1e7   :  { %v1830_v48 = vpack.c.bf16 %v1108_v39, %v1107_v38  ;;  %v391_v39 = vsub.s32 3, %v2243_v2 }
 0x1e9   :  { %1006 = vmatpush1.bf16.msra.mxu0 %v1597_v43  ;;  %1047 = vmatpush1.bf16.msra.mxu1 %v1599_v44  ;;  %v1076_v43 = vld [vmem:[%s2923_s7 + $0x38] sm:$0xff]  ;;  %v1125_v44 = vld [vmem:[%s2923_s7 + $0x1c0] sm:$0xff] }
 0x1ea   :  { %1007 = vmatprep.subr.bf16.mxu0 %v1606_v45  ;;  %1048 = vmatprep.subr.bf16.mxu1 %v1608_v46  ;;  %v1126_v45 = vld [vmem:[%s2923_s7 + $0x1c8] sm:$0xff]  ;;  %v1093_v46 = vld [vmem:[%s2923_s7 + $0xc0] sm:$0xff] }
 0x1eb   :  { %v1800_v53 = vpack.c.bf16 %v1094_v47, %v1093_v46  ;;  %v1166_v47 = vld [vmem:[%s2923_s7 + $0x308] sm:$0xff] }
 0x1ed   :  { %1008 = vmatpush1.bf16.msra.mxu0 %v1605_v49  ;;  %1049 = vmatpush1.bf16.msra.mxu1 %v1607_v50  ;;  %v1798_v49 = vpack.c.bf16 %v1076_v43, %v1075_v42  ;;  %v1109_v50 = vld [vmem:[%s2923_s7 + $0x140] sm:$0xff] }
 0x1ee   :  { %1621 = vmatprep.subr.msk.bf16.mxu0 %vm880_vm3, %v1614_v51  ;;  %1623 = vmatprep.subr.msk.bf16.mxu1 %vm880_vm3, %v1616_v52  ;;  %v1110_v51 = vld [vmem:[%s2923_s7 + $0x148] sm:$0xff]  ;;  %v1832_v52 = vpack.c.bf16 %v1126_v45, %v1125_v44  ;;  %v1165_v44 = vld [vmem:[%s2923_s7 + $0x300] sm:$0xff] }
 0x1ef   :  { %v1834_v60 = vpack.c.bf16 %v1110_v51, %v1109_v50  ;;  %v1152_v51 = vld [vmem:[%s2923_s7 + $0x298] sm:$0xff]  ;;  %v1881_v58 = vpack.c.bf16 %v1166_v47, %v1165_v44 }
 0x1f0   :  { %v1176_v44 = vld [vmem:[%s2923_s7 + $0x358] sm:$0xff] }
 0x1f1   :  { %1010 = vmatpush1.bf16.msra.mxu0 %v894_v61  ;;  %1051 = vmatpush1.bf16.msra.mxu1 %v900_v62  ;;  %v1802_v61 = vpack.c.bf16 %v1078_v55, %v1077_v54  ;;  %v1111_v62 = vld [vmem:[%s2923_s7 + $0x150] sm:$0xff]  ;;  %v1144_v47 = vld [vmem:[%s2923_s7 + $0x258] sm:$0xff] }
 0x1f2   :  { %1817 = vmatprep.subr.bf16.mxu0 %v1816_v63  ;;  %1785 = vmatprep.subr.bf16.mxu1 %v1784_v0  ;;  %v1112_v63 = vld [vmem:[%s2923_s7 + $0x158] sm:$0xff]  ;;  %v1836_v0 = vpack.c.bf16 %v1128_v57, %v1127_v56 }
 0x1f4   :  { %1020 = vmatmul.mubr.bf16.vlgmr.msra.gmra.mrb[8].mxu0 %v2365_v30  ;;  %1061 = vmatmul.mubr.bf16.vlgmr.msra.gmra.mrb[8].mxu1 %v2365_v30  ;;  %v1073_v30 = vld [vmem:[%s2923_s7 + $0x20] sm:$0xff] }
 0x1f5   :  { %1819 = vmatpush3.bf16.msra.mxu0 %v1818_v12  ;;  %1787 = vmatpush3.bf16.msra.mxu1 %v1786_v13  ;;  %v1794_v37 = vpack.c.bf16 %v1074_v31, %v1073_v30  ;;  %v1098_v12 = vld [vmem:[%s2923_s7 + $0xe8] sm:$0xff]  ;;  %v1838_v13 = vpack.c.bf16 %v1112_v63, %v1111_v62  ;;  %v1116_v30 = vld [vmem:[%s2923_s7 + $0x178] sm:$0xff]  ;;  %v1083_v31 = vld [vmem:[%s2923_s7 + $0x70] sm:$0xff] }
 0x1f6   :  { %1821 = vmatprep.subr.bf16.mxu0 %v1820_v16  ;;  %1789 = vmatprep.subr.bf16.mxu1 %v1788_v17  ;;  %v1840_v16 = vpack.c.bf16 %v1130_v10, %v1129_v9  ;;  %v1808_v17 = vpack.c.bf16 %v1098_v12, %v1097_v11  ;;  %v1814_v34 = vpack.c.bf16 %v1084_v32, %v1083_v31  ;;  %v1136_v9 = vld [vmem:[%s2923_s7 + $0x218] sm:$0xff]  ;;  %v1153_v10 = vld [vmem:[%s2923_s7 + $0x2a0] sm:$0xff]  ;;  %v1154_v11 = vld [vmem:[%s2923_s7 + $0x2a8] sm:$0xff] }
 0x1f7   :  { %v1173_v31 = vld [vmem:[%s2923_s7 + $0x340] sm:$0xff] }
 0x1f9   :  { %1823 = vmatpush3.bf16.msra.mxu0 %v1822_v25  ;;  %1791 = vmatpush3.bf16.msra.mxu1 %v1790_v27  ;;  %v1132_v25 = vld [vmem:[%s2923_s7 + $0x1f8] sm:$0xff] }
 0x1fa   :  { %1825 = vmatprep.subr.bf16.mxu0 %v1824_v28  ;;  %1793 = vmatprep.subr.bf16.mxu1 %v1792_v29  ;;  %v1844_v27 = vpack.c.bf16 %v1132_v25, %v1131_v24  ;;  %v1115_v28 = vld [vmem:[%s2923_s7 + $0x170] sm:$0xff]  ;;  %v1812_v29 = vpack.c.bf16 %v1100_v26, %v1099_v23  ;;  %v1172_v25 = vld [vmem:[%s2923_s7 + $0x338] sm:$0xff] }
 0x1fb   :  { %v1846_v33 = vpack.c.bf16 %v1116_v30, %v1115_v28  ;;  %v1139_v23 = vld [vmem:[%s2923_s7 + $0x230] sm:$0xff]  ;;  %v1140_v26 = vld [vmem:[%s2923_s7 + $0x238] sm:$0xff]  ;;  %v1157_v28 = vld [vmem:[%s2923_s7 + $0x2c0] sm:$0xff] }
 0x1fc   :  { %v1862_v32 = vpack.c.bf16 %v1140_v26, %v1139_v23  ;;  %v1190_v23 = vld [vmem:[%s2923_s7 + $0x3c8] sm:$0xff] }
 0x1fd   :  { %1827 = vmatpush3.bf16.msra.mxu0 %v1826_v36  ;;  %1795 = vmatpush3.bf16.msra.mxu1 %v1794_v37  ;;  %v1149_v36 = vld [vmem:[%s2923_s7 + $0x280] sm:$0xff]  ;;  %v1150_v37 = vld [vmem:[%s2923_s7 + $0x288] sm:$0xff] }
 0x1fe   :  { %1829 = vmatprep.subr.bf16.mxu0 %v1828_v40  ;;  %1797 = vmatprep.subr.bf16.mxu1 %v1796_v41  ;;  %v1848_v38 = vpack.c.bf16 %v1150_v37, %v1149_v36  ;;  %v2696_v40 = vld [vmem:[%s2924_s6] sm:$0xff]  ;;  %v387_v41 = vsub.s32 2, %v2243_v2  ;;  %v1142_v37 = vld [vmem:[%s2923_s7 + $0x248] sm:$0xff] }
 0x1ff   :  { %v384_v42 = vrot.slane %v2696_v40, %v2252_v6  ;;  %v392_v43 = vrot.slane %v2696_v40, %v391_v39  ;;  %v380_v45 = vrot.slane %v2696_v40, %v2246_v4  ;;  %v1134_v6 = vld [vmem:[%s2923_s7 + $0x208] sm:$0xff]  ;;  %v1151_v4 = vld [vmem:[%s2923_s7 + $0x290] sm:$0xff]  ;;  %v1141_v36 = vld [vmem:[%s2923_s7 + $0x240] sm:$0xff] }
 0x200   :  { %v388_v46 = vrot.slane %v2696_v40, %v387_v41  ;;  %v1852_v7 = vpack.c.bf16 %v1152_v51, %v1151_v4  ;;  %v1160_v39 = vld [vmem:[%s2923_s7 + $0x2d8] sm:$0xff]  ;;  %v1178_v51 = vld [vmem:[%s2923_s7 + $0x368] sm:$0xff] }
 0x201   :  { %1831 = vmatpush3.bf16.msra.mxu0 %v1830_v48  ;;  %1799 = vmatpush3.bf16.msra.mxu1 %v1798_v49  ;;  %v1133_v48 = vld [vmem:[%s2923_s7 + $0x200] sm:$0xff] }
 0x202   :  { %1833 = vmatprep.subr.bf16.mxu0 %v1832_v52  ;;  %1801 = vmatprep.subr.bf16.mxu1 %v1800_v53 }
 0x205   :  { %1835 = vmatpush3.bf16.msra.mxu0 %v1834_v60  ;;  %1803 = vmatpush3.bf16.msra.mxu1 %v1802_v61  ;;  %v1850_v60 = vpack.c.bf16 %v1134_v6, %v1133_v48  ;;  %v1161_v48 = vld [vmem:[%s2923_s7 + $0x2e0] sm:$0xff]  ;;  %v1162_v6 = vld [vmem:[%s2923_s7 + $0x2e8] sm:$0xff] }
 0x206   :  { %1837 = vmatprep.subr.bf16.mxu0 %v1836_v0  ;;  %1805 = vmatprep.subr.bf16.mxu1 %v1804_v5  ;;  %v1168_v5 = vld [vmem:[%s2923_s7 + $0x318] sm:$0xff] }
 0x207   :  { %v1884_v12 = vpack.c.bf16 %v1168_v5, %v1167_v59 }
 0x209   :  { %1839 = vmatpush3.bf16.msra.mxu0 %v1838_v13  ;;  %1807 = vmatpush3.bf16.msra.mxu1 %v1806_v14  ;;  %v1169_v13 = vld [vmem:[%s2923_s7 + $0x320] sm:$0xff]  ;;  %v1854_v14 = vpack.c.bf16 %v1136_v9, %v1135_v8  ;;  %v1182_v8 = vld [vmem:[%s2923_s7 + $0x388] sm:$0xff] }
 0x20a   :  { %1841 = vmatprep.subr.bf16.mxu0 %v1840_v16  ;;  %1809 = vmatprep.subr.bf16.mxu1 %v1808_v17  ;;  %v1856_v16 = vpack.c.bf16 %v1154_v11, %v1153_v10  ;;  %v1137_v17 = vld [vmem:[%s2923_s7 + $0x220] sm:$0xff]  ;;  %v1183_v10 = vld [vmem:[%s2923_s7 + $0x390] sm:$0xff]  ;;  %v1184_v11 = vld [vmem:[%s2923_s7 + $0x398] sm:$0xff] }
 0x20b   :  { %v1858_v24 = vpack.c.bf16 %v1138_v18, %v1137_v17  ;;  %v407_v17 = vsub.s32 7, %v2243_v2  ;;  %v395_v18 = vsub.s32 4, %v2243_v2 }
 0x20d   :  { %1843 = vmatpush3.bf16.msra.mxu0 %v1842_v21  ;;  %1811 = vmatpush3.bf16.msra.mxu1 %v1810_v22  ;;  %v1887_v21 = vpack.c.bf16 %v1170_v15, %v1169_v13  ;;  %v1171_v22 = vld [vmem:[%s2923_s7 + $0x330] sm:$0xff]  ;;  %v1185_v13 = vld [vmem:[%s2923_s7 + $0x3a0] sm:$0xff] }
 0x20e   :  { %1845 = vmatprep.subr.bf16.mxu0 %v1844_v27  ;;  %1813 = vmatprep.subr.bf16.mxu1 %v1812_v29  ;;  %v1860_v27 = vpack.c.bf16 %v1156_v20, %v1155_v19  ;;  %v1158_v29 = vld [vmem:[%s2923_s7 + $0x2c8] sm:$0xff]  ;;  %v1890_v30 = vpack.c.bf16 %v1172_v25, %v1171_v22  ;;  %v1187_v19 = vld [vmem:[%s2923_s7 + $0x3b0] sm:$0xff]  ;;  %v1188_v20 = vld [vmem:[%s2923_s7 + $0x3b8] sm:$0xff]  ;;  %v408_v22 = vrot.slane %v2696_v40, %v407_v17 }
 0x20f   :  { %v396_v25 = vrot.slane %v2696_v40, %v395_v18 }
 0x211   :  { %1847 = vmatpush3.bf16.msra.mxu0 %v1846_v33  ;;  %1815 = vmatpush3.bf16.msra.mxu1 %v1814_v34  ;;  %v1174_v33 = vld [vmem:[%s2923_s7 + $0x348] sm:$0xff]  ;;  %v1864_v34 = vpack.c.bf16 %v1158_v29, %v1157_v28 }
 0x212   :  { %1880 = vmatprep.subr.bf16.mxu0 %v1941_v35  ;;  %1849 = vmatprep.subr.bf16.mxu1 %v1848_v38  ;;  %v1159_v38 = vld [vmem:[%s2923_s7 + $0x2d0] sm:$0xff]  ;;  %v1893_v41 = vpack.c.bf16 %v1174_v33, %v1173_v31 }
 0x297   :  { %v939_v49 = vpop.f32.mrb[4].mxu0  ;;  %v980_v50 = vpop.f32.mrb[4].mxu1 }
 0x298   :  { %v941_v52 = vpop.f32.mrb[5].mxu0  ;;  %v982_v53 = vpop.f32.mrb[5].mxu1  ;;  %v940_v61 = vadd.f32 %v939_v49, %v380_v45  ;;  %v981_v62 = vadd.f32 %v980_v50, %v388_v46  ;;  %v1868_v45 = vpack.c.bf16 %v1160_v39, %v1159_v38  ;;  %v1143_v46 = vld [vmem:[%s2923_s7 + $0x250] sm:$0xff]  ;;  %v1177_v50 = vld [vmem:[%s2923_s7 + $0x360] sm:$0xff] }
 0x299   :  { %v942_v54 = vadd.f32 %v941_v52, %v384_v42  ;;  %v983_v55 = vadd.f32 %v982_v53, %v392_v43  ;;  %v943_v56 = vpop.f32.mrb[6].mxu0  ;;  %v984_v57 = vpop.f32.mrb[6].mxu1  ;;  %v1175_v42 = vld [vmem:[%s2923_s7 + $0x350] sm:$0xff]  ;;  %v1866_v43 = vpack.c.bf16 %v1142_v37, %v1141_v36  ;;  %v1870_v4 = vpack.c.bf16 %v1144_v47, %v1143_v46  ;;  %v1145_v53 = vld [vmem:[%s2923_s7 + $0x260] sm:$0xff] }
 0x29a   :  { %v944_v63 = vpop.f32.mrb[7].mxu0  ;;  %v985_v0 = vpop.f32.mrb[7].mxu1  ;;  %v1896_v49 = vpack.c.bf16 %v1176_v44, %v1175_v42  ;;  %v1872_v52 = vpack.c.bf16 %v1162_v6, %v1161_v48  ;;  %v1164_v56 = vld [vmem:[%s2923_s7 + $0x2f8] sm:$0xff]  ;;  %v1899_v57 = vpack.c.bf16 %v1178_v51, %v1177_v50  ;;  %v1193_v46 = vld [vmem:[%s2923_s7 + $0x3e0] sm:$0xff] }
 0x29b   :  { %1269 = vmatprep.mubr.f32.mxu1 %v942_v54  ;;  %1339 = vmatprep.mubr.f32.mxu0 %v983_v55  ;;  %v1146_v54 = vld [vmem:[%s2923_s7 + $0x268] sm:$0xff]  ;;  %v1163_v55 = vld [vmem:[%s2923_s7 + $0x2f0] sm:$0xff]  ;;  %v1148_v63 = vld [vmem:[%s2923_s7 + $0x278] sm:$0xff] }
 0x29c   :  { %1270 = vmatmul.mubr.f32.vlgmr.msra.gmra.mrb[2].mxu1 %v940_v61  ;;  %1340 = vmatmul.mubr.f32.vlgmr.msra.gmra.mrb[2].mxu0 %v981_v62  ;;  %v1874_v59 = vpack.c.bf16 %v1146_v54, %v1145_v53  ;;  %v1876_v61 = vpack.c.bf16 %v1164_v56, %v1163_v55  ;;  %v1147_v62 = vld [vmem:[%s2923_s7 + $0x270] sm:$0xff]  ;;  %v1192_v42 = vld [vmem:[%s2923_s7 + $0x3d8] sm:$0xff]  ;;  %v1486_v55 = vand.u32 127, %v46_v1 }
 0x29d   :  { %1882 = vmatpush1.bf16.msra.mxu0 %v1881_v58  ;;  %1851 = vmatpush3.bf16.msra.mxu1 %v1850_v60  ;;  %v1179_v58 = vld [vmem:[%s2923_s7 + $0x370] sm:$0xff]  ;;  %v1180_v60 = vld [vmem:[%s2923_s7 + $0x378] sm:$0xff]  ;;  %v1878_v5 = vpack.c.bf16 %v1148_v63, %v1147_v62 }
 0x29e   :  { %1883 = vmatprep.subr.bf16.mxu0 %v1941_v35  ;;  %1853 = vmatprep.subr.bf16.mxu1 %v1852_v7  ;;  %v1902_v0 = vpack.c.bf16 %v1180_v60, %v1179_v58  ;;  %v1181_v7 = vld [vmem:[%s2923_s7 + $0x380] sm:$0xff]  ;;  %vm1487_vm5 = vcmp.lt.s32.totalorder %v1486_v55, 8  ;;  %vm1507_vm7 = vcmp.eq.s32.totalorder %v1486_v55, 8 }
 0x29f   :  { %v1905_v9 = vpack.c.bf16 %v1182_v8, %v1181_v7 }
 0x2a1   :  { %1885 = vmatpush1.bf16.msra.mxu0 %v1884_v12  ;;  %1855 = vmatpush3.bf16.msra.mxu1 %v1854_v14  ;;  %v1908_v12 = vpack.c.bf16 %v1184_v11, %v1183_v10  ;;  %v1186_v14 = vld [vmem:[%s2923_s7 + $0x3a8] sm:$0xff] }
 0x2a2   :  { %1886 = vmatprep.subr.bf16.mxu0 %v1941_v35  ;;  %1857 = vmatprep.subr.bf16.mxu1 %v1856_v16  ;;  %v1911_v15 = vpack.c.bf16 %v1186_v14, %v1185_v13  ;;  %v399_v16 = vsub.s32 5, %v2243_v2 }
 0x2a5   :  { %1888 = vmatpush1.bf16.msra.mxu0 %v1887_v21  ;;  %1859 = vmatpush3.bf16.msra.mxu1 %v1858_v24  ;;  %v400_v21 = vrot.slane %v2696_v40, %v399_v16  ;;  %v1914_v24 = vpack.c.bf16 %v1188_v20, %v1187_v19 }
 0x2a6   :  { %1889 = vmatprep.subr.bf16.mxu0 %v1941_v35  ;;  %1861 = vmatprep.subr.bf16.mxu1 %v1860_v27  ;;  %v1189_v27 = vld [vmem:[%s2923_s7 + $0x3c0] sm:$0xff] }
 0x2a7   :  { %v1917_v36 = vpack.c.bf16 %v1190_v23, %v1189_v27 }
 0x2a9   :  { %1891 = vmatpush1.bf16.msra.mxu0 %v1890_v30  ;;  %1863 = vmatpush3.bf16.msra.mxu1 %v1862_v32 }
 0x2aa   :  { %1892 = vmatprep.subr.bf16.mxu0 %v1941_v35  ;;  %1865 = vmatprep.subr.bf16.mxu1 %v1864_v34 }
 0x2ad   :  { %1894 = vmatpush1.bf16.msra.mxu0 %v1893_v41  ;;  %1867 = vmatpush3.bf16.msra.mxu1 %v1866_v43  ;;  %v1191_v41 = vld [vmem:[%s2923_s7 + $0x3d0] sm:$0xff]  ;;  %v403_v43 = vsub.s32 6, %v2243_v2  ;;  %v1625_v2 = vld [vmem:[%s2925_s8] ss:$0 sm:$0xff] }
 0x2ae   :  { %1895 = vmatprep.subr.bf16.mxu0 %v1941_v35  ;;  %1869 = vmatprep.subr.bf16.mxu1 %v1868_v45  ;;  %v1920_v44 = vpack.c.bf16 %v1192_v42, %v1191_v41 }
 0x2af   :  { %v404_v45 = vrot.slane %v2696_v40, %v403_v43 }
 0x2b1   :  { %1897 = vmatpush1.bf16.msra.mxu0 %v1896_v49  ;;  %1871 = vmatpush3.bf16.msra.mxu1 %v1870_v4 }
 0x2b2   :  { %1898 = vmatprep.subr.bf16.mxu0 %v1941_v35  ;;  %1873 = vmatprep.subr.bf16.mxu1 %v1872_v52 }
 0x2b5   :  { %1900 = vmatpush1.bf16.msra.mxu0 %v1899_v57  ;;  %1875 = vmatpush3.bf16.msra.mxu1 %v1874_v59 }
 0x2b6   :  { %1901 = vmatprep.subr.bf16.mxu0 %v1941_v35  ;;  %1877 = vmatprep.subr.bf16.mxu1 %v1876_v61 }
 0x2b9   :  { %1903 = vmatpush1.bf16.msra.mxu0 %v1902_v0  ;;  %1879 = vmatpush3.bf16.msra.mxu1 %v1878_v5 }
 0x2ba   :  { %1904 = vmatprep.subr.bf16.mxu0 %v1941_v35 }
 0x2bd   :  { %1906 = vmatpush1.bf16.msra.mxu0 %v1905_v9 }
 0x2be   :  { %1907 = vmatprep.subr.bf16.mxu0 %v1941_v35 }
 0x2c1   :  { %1909 = vmatpush1.bf16.msra.mxu0 %v1908_v12 }
 0x2c2   :  { %1910 = vmatprep.subr.bf16.mxu0 %v1941_v35 }
 0x2c5   :  { %1912 = vmatpush1.bf16.msra.mxu0 %v1911_v15 }
 0x2c6   :  { %1913 = vmatprep.subr.bf16.mxu0 %v1941_v35 }
 0x2c7   :  { %v1021_v26 = vpop.f32.mrb[8].mxu0  ;;  %v1062_v28 = vpop.f32.mrb[8].mxu1 }
 0x2c8   :  { %v1023_v29 = vpop.f32.mrb[9].mxu0  ;;  %v1064_v30 = vpop.f32.mrb[9].mxu1  ;;  %v1022_v37 = vadd.f32 %v1021_v26, %v396_v25  ;;  %v1063_v47 = vadd.f32 %v1062_v28, %v404_v45 }
 0x2c9   :  { %v1024_v31 = vadd.f32 %v1023_v29, %v400_v21  ;;  %v1065_v32 = vadd.f32 %v1064_v30, %v408_v22  ;;  %v1025_v33 = vpop.f32.mrb[10].mxu0  ;;  %v1066_v34 = vpop.f32.mrb[10].mxu1  ;;  %1915 = vmatpush1.bf16.msra.mxu0 %v1914_v24 }
 0x2ca   :  { %v1026_v38 = vpop.f32.mrb[11].mxu0  ;;  %v1067_v39 = vpop.f32.mrb[11].mxu1  ;;  %1916 = vmatprep.subr.bf16.mxu0 %v1941_v35 }
 0x2cb   :  { %1409 = vmatprep.mubr.f32.mxu1 %v1024_v31  ;;  %1626 = vmatprep.mubr.msk.f32.mxu0 %vm1201_vm4, %v1065_v32 }
 0x2cc   :  { %1410 = vmatmul.mubr.f32.vlgmr.msra.gmra.mrb[12].mxu1 %v1022_v37 }
 0x2cd   :  { %1918 = vmatpush1.bf16.msra.mxu0 %v1917_v36 }
 0x2ce   :  { %1919 = vmatprep.subr.bf16.mxu0 %v1941_v35 }
 0x2d1   :  { %1921 = vmatpush1.bf16.msra.mxu0 %v1920_v44 }
 0x2d2   :  { %1471 = vmatprep.subr.mxu0 %v1940_v3 }
 0x2d5   :  { %1472 = vmatpush1.msra.mxu0 %v1193_v46 }
 0x2d6   :  { %1480 = vmatmul.mubr.f32.vlgmr.msra.gmra.mrb[12].mxu0 %v1063_v47 }
 0x36f   :  { %v1659_v48 = vpop.f32.mrb[2].mxu1  ;;  %v1694_v6 = vpop.f32.mrb[2].mxu0 }
 0x370   :  { %v1660_v49 = vpop.f32.mrb[3].mxu1  ;;  %v1695_v35 = vpop.f32.mrb[3].mxu0 }
 0x371   :  { %v1661_v50 = vadd.f32 %v1660_v49, %v1659_v48  ;;  %v1696_v40 = vadd.f32 %v1695_v35, %v1694_v6 }
 0x373   :  { %v1272_v4 = vadd.f32 %v1661_v50, %v1625_v2 }
 0x375   :  { %v1342_v51 = vadd.f32 %v1696_v40, %v1272_v4 }
 0x39f   :  { %v1729_v3 = vpop.f32.mrb[12].mxu1 }
 0x3a0   :  { %v1730_v52 = vpop.f32.mrb[13].mxu1 }
 0x3a1   :  { %v1731_v53 = vadd.f32 %v1730_v52, %v1729_v3 }
 0x3a3   :  { %v1412_v54 = vadd.f32 %v1731_v53, %v1342_v51 }
 0x3a9   :  { %v1481_v56 = vpop.f32.mrb[12].mxu0 }
 0x3aa   :  { %v1482_v57 = vadd.f32 %v1481_v56, %v1412_v54  ;;  %v1483_v58 = vpop.f32.mrb[13].mxu0 }
 0x3ac   :  { %v1502_v59 = vsub.f32 0.0, %v1482_v57  ;;  %v1488_v60 = vsel %vm1487_vm5, %v1482_v57, -1e+30 }
 0x3ad   :  { %v1490_v61 = vsel %vm1489_vm6, %v1488_v60, -inf }
 0x3ae   :  { %v1503_v62 = vmul.f32 1.442695, %v1502_v59  ;;  %1491 = vmax.xlane.f32.xlu0 %v1490_v61 }
 0x3b0   :  { %1932 = vpow2.f32 %v1503_v62 }
 0x3ba   :  { %v1933_v63 = vpop.eup %1932 }
 0x3bb   :  { %v1505_v0 = vadd.f32 1.0, %v1933_v63 }
 0x3bd   :  { %1934 = vrcp.f32 %v1505_v0 }
 0x3c7   :  { %v1935_v5 = vpop.eup %1934 }
 0x3c8   :  { %v1508_v7 = vsel %vm1507_vm7, %v1935_v5, 0.0 }
 0x43b   :  { %v1492_v1 = vpop.xlane.xlu0 %1491 }
 0x43c   :  { %v1493_v8 = vsub.f32 %v1488_v60, %v1492_v1 }
 0x43e   :  { %v1494_v9 = vmul.f32 1.442695, %v1493_v8 }
 0x440   :  { %1936 = vpow2.f32 %v1494_v9 }
 0x44a   :  { %v1937_v10 = vpop.eup %1936 }
 0x44b   :  { %v1496_v11 = vsel %vm1487_vm5, %v1937_v10, 0.0 }
 0x44c   :  { %v1497_v12 = vsel %vm1489_vm6, %v1496_v11, 0.0 }
 0x44d   :  { %1498 = vadd.xlane.f32.xlu0 %v1497_v12 }
 0x4da   :  { %v1499_v13 = vpop.xlane.xlu0 %1498 }
 0x4db   :  { %1938 = vrcp.f32 %v1499_v13 }
 0x4e5   :  { %v1939_v14 = vpop.eup %1938 }
 0x4e6   :  { %v1501_v15 = vmul.f32 %v1939_v14, %v1496_v11 }
 0x4e8   :  { %v1509_v16 = vsel %vm1487_vm5, %v1501_v15, %v1508_v7 }
 0x4e9   :  { %1510 = vst.msk [vmem:[%s2926_s9] sm:$0x3] %vm1489_vm6, %v1509_v16 }

</bundles_post_ra>
